<compile_context>
chip_gen: v5e
topology: v5e:2x2
jax: 0.10.0
libtpu: 0.0.40
codegen_flags: <defaults>
</compile_context>

<pallas_src>
import functools

import jax
import jax.numpy as jnp
from jax import lax
from jax.experimental import pallas as pl
from jax.experimental.pallas import tpu as pltpu


def _conv3x3_kernel(w_ref, x0_ref, x1_ref, x2_ref, o_ref, *, tr, width, cin):
    """One grid step: 3x3 conv over a halo row tile as a single MXU matmul.

    w_ref : (Cout, 9*Cin)          flattened weight, (dh, dw, cin)-major, resident
    xi_ref: (Cin, (TR+2)*W)        dw=i shifted halo window, spatially flattened
    o_ref : (Cout, TR*W)           lane-dense output block (no padded columns)
    """
    xs = (x0_ref, x1_ref, x2_ref)                      # indexed by dw
    # Build patches^T (9*Cin, TR*W) in VMEM: static lane-offset loads of the
    # three dh row-shifts from each dw-shifted window.  Row order (dh, dw, cin)
    # matches the weight flattening below.
    taps = [xs[dw][:, pl.ds(dh * width, tr * width)]
            for dh in range(3) for dw in range(3)]
    p_t = jnp.concatenate(taps, axis=0)                # (9*Cin, TR*W)
    o_ref[...] = jnp.dot(
        w_ref[...], p_t, preferred_element_type=jnp.float32
    ).astype(o_ref.dtype)


def _pick_row_tile(h, w, target_m):
    """Largest TR with TR | H, lane-dense TR*W (or TR == H), TR*W <= target_m."""
    divisors = [d for d in range(1, h + 1) if h % d == 0]
    valid = [d for d in divisors if d == h or (d * w) % 128 == 0]
    fitting = [d for d in valid if d * w <= target_m]
    # Note: for awkward (H, W) the fallback is the smallest valid tile (possibly
    # the whole image); fine for typical vision shapes.
    return max(fitting) if fitting else min(valid)


@functools.partial(jax.jit, static_argnames=("target_m",))
def overlap_patch_embed(x_nchw, weight, *, target_m=2048):
    """Matches nn.Conv2d(Cin, Cout, kernel_size=3, stride=1, padding=1, bias=False).

    x_nchw: (N, Cin, H, W) f32; weight: (Cout, Cin, 3, 3) f32.
    Returns (N, Cout, H, W) f32.
    """
    N, Cin, H, W = x_nchw.shape
    Cout = weight.shape[0]
    K = 9 * Cin

    tr = _pick_row_tile(H, W, target_m)                # rows per grid step
    n_tiles = H // tr

    # One zero-pad pass over x (the input stream is the smallest HBM term).
    x_pad = jnp.pad(x_nchw, ((0, 0), (0, 0), (1, 1), (1, 1)))   # (N,Cin,H+2,W+2)

    # Three dw-shifted, width-cropped, spatially flattened copies of x_pad:
    # (N, Cin, (H+2)*W).  This is ~3x Cin*4 B/pixel of wrapper traffic versus
    # the previous 9x im2col slab (9*Cin*4 B/pixel written + re-read).
    x_shift = [
        x_pad[:, :, :, dw:dw + W].reshape(N, Cin, (H + 2) * W) for dw in range(3)
    ]

    # Overlapping halo row-windows (rows [r*TR, r*TR+TR+2)) so a standard
    # Blocked BlockSpec (auto double-buffered DMA) can feed the kernel.  When
    # the whole image is one tile this is a free expand_dims (no duplication).
    win_len = (tr + 2) * W
    if n_tiles == 1:
        x_wins = [s[:, None] for s in x_shift]                   # (N,1,Cin,win)
    else:
        x_wins = [
            jnp.concatenate(
                [s[:, None, :, r * tr * W:(r * tr + tr + 2) * W]
                 for r in range(n_tiles)], axis=1)               # (N,nT,Cin,win)
            for s in x_shift
        ]

    # Flattened weight (Cout, 9*Cin), (dh, dw, cin)-major to match the taps.
    w_flat = jnp.transpose(weight, (0, 2, 3, 1)).reshape(Cout, K)

    kernel = functools.partial(_conv3x3_kernel, tr=tr, width=W, cin=Cin)

    flops = 2 * N * H * W * K * Cout
    bytes_accessed = 4 * (3 * N * n_tiles * Cin * win_len + Cout * K
                          + N * Cout * H * W)

    # Per-step VMEM estimate (lane-padded); only raise the scoped limit if we
    # actually approach the 32 MiB default (keeps v7x's 64 MiB budget safe).
    lane = lambda d: -(-d // 128) * 128
    est = 4 * (3 * 2 * 8 * lane(win_len)          # 3 halo windows, double-buffered
               + 2 * Cout * lane(tr * W)          # output block, double-buffered
               + 2 * Cout * lane(K)               # resident weight
               + 3 * 9 * Cin * lane(tr * W))      # im2col temporaries
    cp_kwargs = dict(dimension_semantics=("parallel", "parallel"))
    if est > 24 * 1024 * 1024:
        cp_kwargs["vmem_limit_bytes"] = int(min(2 * est, 64 * 1024 * 1024))

    win_spec = pl.BlockSpec((None, None, Cin, win_len),
                            lambda n, r: (n, r, 0, 0))

    out = pl.pallas_call(
        kernel,
        out_shape=jax.ShapeDtypeStruct((N, Cout, H * W), x_nchw.dtype),
        grid_spec=pltpu.PrefetchScalarGridSpec(
            num_scalar_prefetch=0,
            grid=(N, n_tiles),
            in_specs=[
                pl.BlockSpec((Cout, K), lambda n, r: (0, 0)),    # resident weight
                win_spec, win_spec, win_spec,                    # dw = 0, 1, 2
            ],
            out_specs=pl.BlockSpec((None, Cout, tr * W),
                                   lambda n, r: (n, 0, r)),
        ),
        compiler_params=pltpu.CompilerParams(**cp_kwargs),
        cost_estimate=pl.CostEstimate(flops=flops, transcendentals=0,
                                      bytes_accessed=bytes_accessed),
    )(w_flat, *x_wins)

    # Free metadata reshape to NCHW -- no extra HBM pass.
    return out.reshape(N, Cout, H, W)


if __name__ == "__main__":
    # Module defaults: in_c=3, embed_dim=48; small spatial size, batch=2.
    N, Cin, H, W = 2, 3, 16, 16
    Cout = 48

    key = jax.random.PRNGKey(0)
    kx, kw = jax.random.split(key)
    x = jax.random.normal(kx, (N, Cin, H, W), dtype=jnp.float32)
    # Deterministic synthetic weights (Conv2d weight shape: (Cout, Cin, 3, 3)).
    weight = jax.random.normal(kw, (Cout, Cin, 3, 3), dtype=jnp.float32) * 0.1

    out = jax.block_until_ready(overlap_patch_embed(x, weight))

    # Cross-check against XLA's conv (pure-JAX reference).
    ref = lax.conv_general_dilated(
        x, weight, window_strides=(1, 1), padding=((1, 1), (1, 1)),
        dimension_numbers=("NCHW", "OIHW", "NCHW"))
    assert out.shape == (N, Cout, H, W)
    max_err = float(jnp.max(jnp.abs(out - ref)))
    assert jnp.allclose(out, ref, atol=5e-3, rtol=5e-3), max_err

    print("KERNEL_OK")
</pallas_src>

<mosaic_0001>
module attributes {stable_mosaic.version = 11 : i64} {
  func.func @_conv3x3_kernel(%arg0: i32, %arg1: i32, %arg2: memref<48x27xf32, #tpu.memory_space<vmem>>, %arg3: memref<1x1x3x288xf32, #tpu.memory_space<vmem>>, %arg4: memref<1x1x3x288xf32, #tpu.memory_space<vmem>>, %arg5: memref<1x1x3x288xf32, #tpu.memory_space<vmem>>, %arg6: memref<1x48x256xf32, #tpu.memory_space<vmem>>) attributes {dimension_semantics = [#tpu.dimension_semantics<parallel>, #tpu.dimension_semantics<parallel>], iteration_bounds = array<i64: 2, 1>, scalar_prefetch = 0 : i64, scratch_operands = 0 : i64, tpu.core_type = #tpu.core_type<tc>, window_params = [{pipeline_mode = #tpu.pipeline_mode<synchronous>, transform_indices = @transform_0, window_bounds = array<i64: 48, 27>}, {transform_indices = @transform_1, window_bounds = array<i64: 1, 1, 3, 288>}, {transform_indices = @transform_2, window_bounds = array<i64: 1, 1, 3, 288>}, {transform_indices = @transform_3, window_bounds = array<i64: 1, 1, 3, 288>}, {transform_indices = @transform_4, window_bounds = array<i64: 1, 48, 256>}]} {
    %c0 = arith.constant 0 : index
    %c0_0 = arith.constant 0 : index
    %c0_1 = arith.constant 0 : index
    %c0_2 = arith.constant 0 : index
    %0 = vector.load %arg3[%c0, %c0_0, %c0_1, %c0_2] : memref<1x1x3x288xf32, #tpu.memory_space<vmem>>, vector<1x1x3x256xf32>
    %1 = vector.shape_cast %0 : vector<1x1x3x256xf32> to vector<3x256xf32>
    %c0_3 = arith.constant 0 : index
    %c0_4 = arith.constant 0 : index
    %c0_5 = arith.constant 0 : index
    %c0_6 = arith.constant 0 : index
    %2 = vector.load %arg4[%c0_3, %c0_4, %c0_5, %c0_6] : memref<1x1x3x288xf32, #tpu.memory_space<vmem>>, vector<1x1x3x256xf32>
    %3 = vector.shape_cast %2 : vector<1x1x3x256xf32> to vector<3x256xf32>
    %c0_7 = arith.constant 0 : index
    %c0_8 = arith.constant 0 : index
    %c0_9 = arith.constant 0 : index
    %c0_10 = arith.constant 0 : index
    %4 = vector.load %arg5[%c0_7, %c0_8, %c0_9, %c0_10] : memref<1x1x3x288xf32, #tpu.memory_space<vmem>>, vector<1x1x3x256xf32>
    %5 = vector.shape_cast %4 : vector<1x1x3x256xf32> to vector<3x256xf32>
    %c0_11 = arith.constant 0 : index
    %c0_12 = arith.constant 0 : index
    %c0_13 = arith.constant 0 : index
    %c16 = arith.constant 16 : index
    %6 = vector.load %arg3[%c0_11, %c0_12, %c0_13, %c16] : memref<1x1x3x288xf32, #tpu.memory_space<vmem>>, vector<1x1x3x256xf32>
    %7 = vector.shape_cast %6 : vector<1x1x3x256xf32> to vector<3x256xf32>
    %c0_14 = arith.constant 0 : index
    %c0_15 = arith.constant 0 : index
    %c0_16 = arith.constant 0 : index
    %c16_17 = arith.constant 16 : index
    %8 = vector.load %arg4[%c0_14, %c0_15, %c0_16, %c16_17] : memref<1x1x3x288xf32, #tpu.memory_space<vmem>>, vector<1x1x3x256xf32>
    %9 = vector.shape_cast %8 : vector<1x1x3x256xf32> to vector<3x256xf32>
    %c0_18 = arith.constant 0 : index
    %c0_19 = arith.constant 0 : index
    %c0_20 = arith.constant 0 : index
    %c16_21 = arith.constant 16 : index
    %10 = vector.load %arg5[%c0_18, %c0_19, %c0_20, %c16_21] : memref<1x1x3x288xf32, #tpu.memory_space<vmem>>, vector<1x1x3x256xf32>
    %11 = vector.shape_cast %10 : vector<1x1x3x256xf32> to vector<3x256xf32>
    %c0_22 = arith.constant 0 : index
    %c0_23 = arith.constant 0 : index
    %c0_24 = arith.constant 0 : index
    %c32 = arith.constant 32 : index
    %12 = vector.load %arg3[%c0_22, %c0_23, %c0_24, %c32] : memref<1x1x3x288xf32, #tpu.memory_space<vmem>>, vector<1x1x3x256xf32>
    %13 = vector.shape_cast %12 : vector<1x1x3x256xf32> to vector<3x256xf32>
    %c0_25 = arith.constant 0 : index
    %c0_26 = arith.constant 0 : index
    %c0_27 = arith.constant 0 : index
    %c32_28 = arith.constant 32 : index
    %14 = vector.load %arg4[%c0_25, %c0_26, %c0_27, %c32_28] : memref<1x1x3x288xf32, #tpu.memory_space<vmem>>, vector<1x1x3x256xf32>
    %15 = vector.shape_cast %14 : vector<1x1x3x256xf32> to vector<3x256xf32>
    %c0_29 = arith.constant 0 : index
    %c0_30 = arith.constant 0 : index
    %c0_31 = arith.constant 0 : index
    %c32_32 = arith.constant 32 : index
    %16 = vector.load %arg5[%c0_29, %c0_30, %c0_31, %c32_32] : memref<1x1x3x288xf32, #tpu.memory_space<vmem>>, vector<1x1x3x256xf32>
    %17 = vector.shape_cast %16 : vector<1x1x3x256xf32> to vector<3x256xf32>
    %18 = tpu.concatenate %1, %3, %5, %7, %9, %11, %13, %15, %17 in 0 : vector<3x256xf32>, vector<3x256xf32>, vector<3x256xf32>, vector<3x256xf32>, vector<3x256xf32>, vector<3x256xf32>, vector<3x256xf32>, vector<3x256xf32>, vector<3x256xf32> -> vector<27x256xf32>
    %c0_33 = arith.constant 0 : index
    %c0_34 = arith.constant 0 : index
    %19 = vector.load %arg2[%c0_33, %c0_34] : memref<48x27xf32, #tpu.memory_space<vmem>>, vector<48x27xf32>
    %cst = arith.constant dense<0.000000e+00> : vector<48x256xf32>
    %20 = tpu.matmul %19, %18, %cst {dimension_numbers = #tpu.dot_dimension_numbers<[1], [0], [0], [1], [0, 0, 1, 1], [], []>} : vector<48x27xf32>, vector<27x256xf32>, vector<48x256xf32> -> vector<48x256xf32>
    %c0_35 = arith.constant 0 : index
    %c0_36 = arith.constant 0 : index
    %c0_37 = arith.constant 0 : index
    %21 = vector.load %arg6[%c0_35, %c0_36, %c0_37] : memref<1x48x256xf32, #tpu.memory_space<vmem>>, vector<1x48x256xf32>
    %22 = vector.shape_cast %21 : vector<1x48x256xf32> to vector<48x256xf32>
    %23 = vector.shape_cast %20 : vector<48x256xf32> to vector<1x48x256xf32>
    tpu.vector_store %arg6[%c0_35, %c0_36, %c0_37], %23 {strides = array<i32>} : memref<1x48x256xf32, #tpu.memory_space<vmem>>, vector<1x48x256xf32>,
    return
  }
  func.func @transform_0(%arg0: i32, %arg1: i32) -> (i32, i32) {
    %c0_i32 = arith.constant 0 : i32
    %c0_i32_0 = arith.constant 0 : i32
    %c0_i32_1 = arith.constant 0 : i32
    return %c0_i32, %c0_i32_0 : i32, i32
  }
  func.func @transform_1(%arg0: i32, %arg1: i32) -> (i32, i32, i32, i32) {
    %c0_i32 = arith.constant 0 : i32
    %c0_i32_0 = arith.constant 0 : i32
    %c0_i32_1 = arith.constant 0 : i32
    return %arg0, %arg1, %c0_i32, %c0_i32_0 : i32, i32, i32, i32
  }
  func.func @transform_2(%arg0: i32, %arg1: i32) -> (i32, i32, i32, i32) {
    %c0_i32 = arith.constant 0 : i32
    %c0_i32_0 = arith.constant 0 : i32
    %c0_i32_1 = arith.constant 0 : i32
    return %arg0, %arg1, %c0_i32, %c0_i32_0 : i32, i32, i32, i32
  }
  func.func @transform_3(%arg0: i32, %arg1: i32) -> (i32, i32, i32, i32) {
    %c0_i32 = arith.constant 0 : i32
    %c0_i32_0 = arith.constant 0 : i32
    %c0_i32_1 = arith.constant 0 : i32
    return %arg0, %arg1, %c0_i32, %c0_i32_0 : i32, i32, i32, i32
  }
  func.func @transform_4(%arg0: i32, %arg1: i32) -> (i32, i32, i32) {
    %c0_i32 = arith.constant 0 : i32
    %c0_i32_0 = arith.constant 0 : i32
    return %arg0, %c0_i32, %arg1 : i32, i32, i32
  }
}

</mosaic_0001>

<bundles_post_ra>
// kernel: overlap_patch_embed.1
= control target key start
LH: loop header
LB: loop body
LE: loop exit
PB: predicated region body
PF: predicated region fallthrough
CT: control target
= control target key end

     0   :  { %s854_s15 = smov 0   ;;  %s856_s16 = smov 0   ;;  %s984_s0 = inlined_call_operand.vmem [shape: f32[48,27], index: 0, kind: input, shape index: {}]   ;;  %s985_s1 = inlined_call_operand.vmem [shape: f32[2,1,3,288], index: 1, kind: input, shape index: {}]   ;;  %s986_s2 = inlined_call_operand.vmem [shape: f32[2,1,3,288], index: 2, kind: input, shape index: {}]   ;;  %s987_s3 = inlined_call_operand.vmem [shape: f32[2,1,3,288], index: 3, kind: input, shape index: {}]   ;;  %s988_s4 = inlined_call_operand.vmem [shape: f32[2,48,256], index: 4, kind: output, shape index: {}]  }
   0x1   :  { %s858_s17 = smov 0  }
   0x2 LB: > { %s26_s18 = sadd.s32 1, %s821_s16  ;;  %p711_p0 = scmp.ge.s32.totalorder %s825_s17, 1  ;;  %s825_s17 = sphi %s858_s17, %s14_s17   ;;  %s821_s16 = sphi %s856_s16, %s990_s16   ;;  %s817_s15 = sphi %s854_s15, %s989_s15  }
   0x3   : > { %p28_p1 = scmp.ge.s32.totalorder %s26_s18, 2  ;;  %p214_p2 = scmp.lt.s32.totalorder %s825_s17, 3 }
   0x5   : > { %s992_s18 = smov (%p28_p1, %s26_s18), 0  ;;  %p215_p3 = pnand %p711_p0, %p214_p2 }
   0x6   : > { %p266_p4 = scmp.lt.s32.totalorder (!%p215_p3), %s817_s15, 1  ;;  %s827_s29 = smov (!%p215_p3), 112  }
   0x7   : > { %218 = sbr.rel (%p215_p3) target bundleno = 366 (0x16e), region = 36  ;;  %s828_s30 = smov (!%p215_p3), 96  }
   0xc   : > { %s994_s15 = smov (!%p266_p4, %s817_s15), 1  ;;  %vm405_vm0 = vcmask 785408   ;;  %vm443_vm1 = vcmask 1042432   ;;  %vm347_vm2 = vcmask 916480   ;;  %vm449_vm3 = vcmask 1040384  }
   0xd   : > { %s740_s19 = smul.u32 12, %s994_s15  ;;  %vm458_vm4 = vcmask 1041408   ;;  %vm452_vm5 = vcmask 1043456   ;;  %vm455_vm6 = vcmask 1046528   ;;  %vm461_vm7 = vcmask 1044480  }
   0xe   : > { %vm446_vm8 = vcmask 1045504   ;;  %vm470_vm9 = vcmask 220160   ;;  %s741_s21 = smul.u32 96, %s994_s15 }
   0xf   : > { %s274_s22 = scalar_lea.vmem %s985_s1, %s740_s19  ;;  %s283_s25 = scalar_lea.vmem %s986_s2, %s740_s19 }
  0x10   : > { %v303_v0 = vld [vmem:[%s274_s22] sm:$0x77]  ;;  %v306_v1 = vld [vmem:[%s274_s22 + $0x8] sm:$0x7]  ;;  %s292_s28 = scalar_lea.vmem %s987_s3, %s740_s19  ;;  %s301_s24 = scalar_lea.vmem %s988_s4, %s741_s21 }
  0x11   : > { %310 = vst [vmem:[#allocation1] ss:$2 sm:$0xff] %v303_v0  ;;  %v304_v2 = vld [vmem:[%s283_s25] sm:$0x77]  ;;  %v307_v3 = vld [vmem:[%s283_s25 + $0x8] sm:$0x7] }
  0x12   : > { %334 = vst [vmem:[#allocation1 + $0x10] ss:$2 sm:$0xff] %v306_v1  ;;  %v305_v7 = vld [vmem:[%s292_s28] sm:$0x77]  ;;  %v308_v8 = vld [vmem:[%s292_s28 + $0x8] sm:$0x7] }
  0x18   : > { %v881_v4 = vld.sshfl [vmem:[#allocation1] sm:$0xff pattern:$0x75316420]  ;;  %v883_v5 = vld.sshfl [vmem:[#allocation1 + $0x8] sm:$0xff pattern:$0x75316420] }
  0x19   : > { %316 = vst [vmem:[#allocation1] ss:$2 sm:$0xff] %v304_v2  ;;  %v337_v6 = vld.sshfl [vmem:[#allocation1 + $0x10] sm:$0xff pattern:$0x75316420] }
  0x1a   : > { %356 = vst [vmem:[#allocation1 + $0x11] ss:$2 sm:$0xff] %v307_v3  ;;  %v340_v16 = vrot.slane %v337_v6, 7 }
  0x20   : > { %v888_v9 = vld.sshfl [vmem:[#allocation1] sm:$0xff pattern:$0x75316420]  ;;  %v890_v10 = vld.sshfl [vmem:[#allocation1 + $0x8] sm:$0xff pattern:$0x75316420] }
  0x21   : > { %324 = vst [vmem:[#allocation1] ss:$2 sm:$0xff] %v305_v7  ;;  %v359_v11 = vld.sshfl [vmem:[#allocation1 + $0x10] sm:$0xff pattern:$0x75316420] }
  0x22   : > { %373 = vst [vmem:[#allocation1 + $0x10] ss:$2 sm:$0xff] %v308_v8 }
  0x28   : > { %v892_v12 = vld.sshfl [vmem:[#allocation1] sm:$0xff pattern:$0x75316420]  ;;  %v894_v13 = vld.sshfl [vmem:[#allocation1 + $0x8] sm:$0xff pattern:$0x75316420] }
  0x29   : > { %332 = vst [vmem:[#allocation1] ss:$2 sm:$0xff] %v303_v0  ;;  %v376_v14 = vld.sshfl [vmem:[#allocation1 + $0x10] sm:$0xff pattern:$0x75316420]  ;;  %v327_v6 = vrot.slane %v892_v12, 2 }
  0x2a   : > { %392 = vst [vmem:[#allocation1 + $0x10] ss:$2 sm:$0xff] %v306_v1  ;;  %v379_v15 = vrot.slane %v376_v14, 1  ;;  %v319_v14 = vrot.slane %v888_v9, 5 }
  0x30   : > { %v335_v17 = vld.sshfl [vmem:[#allocation1] sm:$0xff pattern:$0x75316420]  ;;  %v336_v18 = vld.sshfl [vmem:[#allocation1 + $0x8] sm:$0xff pattern:$0x75316420] }
  0x31   : > { %v338_v19 = vrot.slane %v335_v17, 7  ;;  %v395_v20 = vld.sshfl [vmem:[#allocation1 + $0x10] sm:$0xff pattern:$0x75316420]  ;;  %v339_v21 = vrot.slane %v336_v18, 7 }
  0x32   : > { %412 = vst [vmem:[#allocation1 + $0x10] ss:$2 sm:$0xff] %v307_v3  ;;  %v398_v39 = vrot.slane %v395_v20, 6 }
  0x33   : > { %v768_v22 = vpack.i.bf16 %v338_v19, %v379_v15  ;;  %v773_v23 = vpack.i.bf16 %v340_v16, %v339_v21  ;;  %354 = vst [vmem:[#allocation1 + $0x1] ss:$2 sm:$0xff] %v304_v2 }
  0x35   : > { %769 = vrot.lane.b32.xlu0 %v768_v22, %s827_s29  ;;  %774 = vrot.lane.b32.xlu1 %v773_v23, %s827_s29 }
  0x39   : > { %v415_v24 = vld.sshfl [vmem:[#allocation1 + $0x10] sm:$0xff pattern:$0x75316420] }
  0x3a   : > { %431 = vst [vmem:[#allocation1 + $0x10] ss:$2 sm:$0xff] %v308_v8  ;;  %v357_v25 = vld.sshfl [vmem:[#allocation1] sm:$0xff pattern:$0x75316420]  ;;  %v418_v47 = vrot.slane %v415_v24, 3  ;;  %v444_v24 = vsel %vm443_vm1, %v881_v4, %v319_v14 }
  0x3b   : > { %v358_v26 = vld.sshfl [vmem:[#allocation1 + $0x8] sm:$0xff pattern:$0x75316420] }
  0x3c   : > { %371 = vst [vmem:[#allocation1] ss:$2 sm:$0xff] %v305_v7  ;;  %v798_v38 = vpack.i.bf16 %v358_v26, %v357_v25 }
  0x41   : > { %v434_v27 = vld.sshfl [vmem:[#allocation1 + $0x10] sm:$0xff pattern:$0x75316420] }
  0x42   : > { %439 = vrot.lane.b32.xlu0 %v434_v27, %s828_s30 }
  0x43   : > { %v374_v28 = vld.sshfl [vmem:[#allocation1] sm:$0xff pattern:$0x75316420]  ;;  %v375_v29 = vld.sshfl [vmem:[#allocation1 + $0x8] sm:$0xff pattern:$0x75316420] }
  0x44   : > { %v377_v30 = vrot.slane %v374_v28, 1  ;;  %v378_v31 = vrot.slane %v375_v29, 1  ;;  %390 = vst [vmem:[#allocation1] ss:$2 sm:$0xff] %v303_v0 }
  0x46   : > { %v778_v32 = vpack.i.bf16 %v378_v31, %v377_v30  ;;  %v320_v31 = vrot.slane %v890_v10, 5  ;;  %v464_v10 = vld [vmem:[%s984_s0] sm:$0xff] }
  0x4a   : > { %779 = vrot.lane.b32.xlu0 %v778_v32, %s827_s29 }
  0x4b   : > { %v393_v33 = vld.sshfl [vmem:[#allocation1] sm:$0xff pattern:$0x75316420]  ;;  %v394_v34 = vld.sshfl [vmem:[#allocation1 + $0x8] sm:$0xff pattern:$0x75316420] }
  0x4c   : > { %v396_v35 = vrot.slane %v393_v33, 6  ;;  %v397_v36 = vrot.slane %v394_v34, 6  ;;  %410 = vst [vmem:[#allocation1] ss:$2 sm:$0xff] %v304_v2  ;;  %v328_v33 = vrot.slane %v894_v13, 2 }
  0x4e   : > { %v783_v37 = vpack.i.bf16 %v397_v36, %v396_v35  ;;  %v447_v35 = vsel %vm446_vm8, %v444_v24, %v327_v6  ;;  %v467_v36 = vld [vmem:[%s984_s0 + $0x18] sm:$0xff] }
  0x50   : > { %784 = vrot.lane.b32.xlu1 %v783_v37, %s828_s30  ;;  %v445_v37 = vsel %vm443_vm1, %v883_v5, %v320_v31  ;;  %v468_v5 = vld [vmem:[%s984_s0 + $0x20] sm:$0xff] }
  0x52   : > { %799 = vrot.lane.b32.xlu0 %v798_v38, %s827_s29 }
  0x53   : > { %v413_v40 = vld.sshfl [vmem:[#allocation1] sm:$0xff pattern:$0x75316420]  ;;  %v414_v41 = vld.sshfl [vmem:[#allocation1 + $0x8] sm:$0xff pattern:$0x75316420] }
  0x54   : > { %v416_v42 = vrot.slane %v413_v40, 3  ;;  %429 = vst [vmem:[#allocation1] ss:$2 sm:$0xff] %v305_v7  ;;  %v417_v46 = vrot.slane %v414_v41, 3 }
  0x56   : > { %v788_v43 = vpack.i.bf16 %v416_v42, %v398_v39  ;;  %v793_v48 = vpack.i.bf16 %v418_v47, %v417_v46  ;;  %v448_v42 = vsel %vm446_vm8, %v445_v37, %v328_v33 }
  0x58   : > { %789 = vrot.lane.b32.xlu1 %v788_v43, %s828_s30  ;;  %v465_v43 = vld [vmem:[%s984_s0 + $0x8] sm:$0xff] }
  0x5b   : > { %v432_v44 = vld.sshfl [vmem:[#allocation1] sm:$0xff pattern:$0x75316420]  ;;  %v433_v45 = vld.sshfl [vmem:[#allocation1 + $0x8] sm:$0xff pattern:$0x75316420] }
  0x5c   : > { %435 = vrot.lane.b32.xlu2 %v432_v44, %s828_s30  ;;  %v469_v44 = vld [vmem:[%s984_s0 + $0x28] sm:$0xff] }
  0x60   : > { %364 = vrot.lane.b32.xlu1 %v359_v11, %s827_s29 }
  0x64   : > { %437 = vrot.lane.b32.xlu2 %v433_v45, %s828_s30  ;;  %v466_v45 = vld [vmem:[%s984_s0 + $0x10] sm:$0xff] }
  0x6c   : > { %794 = vrot.lane.b32.xlu2 %v793_v48, %s828_s30 }
  0xa7   : > { %v770_v49 = vpop.permute.xlu0 %769  ;;  %v775_v52 = vpop.permute.xlu1 %774 }
  0xa8   : > { %v772_v58 = vunpack.i.h.bf16 %v770_v49  ;;  %v776_v59 = vunpack.i.l.bf16 %v775_v52  ;;  %v771_v15 = vunpack.i.l.bf16 %v770_v49  ;;  %v777_v16 = vunpack.i.h.bf16 %v775_v52 }
  0xaa   : > { %v348_v3 = vsel %vm347_vm2, %v772_v58, %v776_v59  ;;  %v349_v4 = vsel %vm347_vm2, %v776_v59, %v777_v16 }
  0xab   : > { %v450_v22 = vsel %vm449_vm3, %v327_v6, %v348_v3  ;;  %v451_v39 = vsel %vm449_vm3, %v328_v33, %v349_v4 }
  0xb4   : > { %v440_v50 = vpop.permute.xlu0 %439 }
  0xb6   : > { %v436_v51 = vpop.permute.xlu2 %435 }
  0xbc   : > { %v780_v53 = vpop.permute.xlu0 %779 }
  0xbd   : > { %v781_v61 = vunpack.i.l.bf16 %v780_v53  ;;  %v782_v7 = vunpack.i.h.bf16 %v780_v53 }
  0xbe   : > { %v438_v54 = vpop.permute.xlu2 %437 }
  0xbf   : > { %v441_v55 = vsel %vm405_vm0, %v436_v51, %v438_v54  ;;  %v442_v56 = vsel %vm405_vm0, %v438_v54, %v440_v50  ;;  %v386_v18 = vsel %vm347_vm2, %v781_v61, %v782_v7  ;;  %v387_v23 = vsel %vm347_vm2, %v782_v7, %v771_v15 }
  0xc0   : > { %716 = vmatpush.msk.msra.mxu0 %vm443_vm1, %v441_v55  ;;  %732 = vmatpush.msk.msra.mxu2 %vm443_vm1, %v441_v55 }
  0xc1   : > { %723 = vmatpush.msk.msra.mxu1 %vm443_vm1, %v442_v56  ;;  %736 = vmatpush.msk.msra.mxu3 %vm443_vm1, %v442_v56 }
  0xc2   : > { %v785_v57 = vpop.permute.xlu1 %784 }
  0xc3   : > { %v787_v62 = vunpack.i.h.bf16 %v785_v57  ;;  %v786_v63 = vunpack.i.l.bf16 %v785_v57 }
  0xc4   : > { %v800_v60 = vpop.permute.xlu0 %799 }
  0xc5   : > { %v802_v0 = vunpack.i.h.bf16 %v800_v60  ;;  %v801_v1 = vunpack.i.l.bf16 %v800_v60  ;;  %v406_v19 = vsel %vm405_vm0, %v786_v63, %v787_v62 }
  0xc6   : > { %v795_v2 = vpop.permute.xlu2 %794  ;;  %v459_v26 = vsel %vm458_vm4, %v386_v18, %v406_v19 }
  0xc7   : > { %v797_v8 = vunpack.i.h.bf16 %v795_v2  ;;  %v796_v11 = vunpack.i.l.bf16 %v795_v2  ;;  %v366_v20 = vsel %vm347_vm2, %v801_v1, %v802_v0 }
  0xc8   : > { %v453_v28 = vsel %vm452_vm5, %v450_v22, %v366_v20 }
  0xc9   : > { %v426_v9 = vsel %vm405_vm0, %v796_v11, %v797_v8  ;;  %v456_v34 = vsel %vm455_vm6, %v453_v28, %v386_v18 }
  0xca   : > { %v790_v17 = vpop.permute.xlu1 %789 }
  0xcb   : > { %v792_v21 = vunpack.i.h.bf16 %v790_v17  ;;  %v791_v12 = vunpack.i.l.bf16 %v790_v17 }
  0xcd   : > { %v425_v25 = vsel %vm405_vm0, %v792_v21, %v796_v11  ;;  %v407_v27 = vsel %vm405_vm0, %v787_v62, %v791_v12 }
  0xce   : > { %v462_v29 = vsel %vm461_vm7, %v459_v26, %v425_v25  ;;  %v460_v30 = vsel %vm458_vm4, %v387_v23, %v407_v27 }
  0xcf   : > { %506 = vmatpush.msra.mxu0 %v462_v29  ;;  %733 = vmatpush.msra.mxu2 %v462_v29  ;;  %v463_v32 = vsel %vm461_vm7, %v460_v30, %v426_v9 }
  0xd0   : > { %541 = vmatpush.msra.mxu1 %v463_v32  ;;  %737 = vmatpush.msra.mxu3 %v463_v32 }
  0xd1   : > { %507 = vmatpush.msra.mxu0 %v456_v34  ;;  %734 = vmatpush.msra.mxu2 %v456_v34 }
  0xd2   : > { %v365_v13 = vpop.permute.xlu1 %364 }
  0xd3   : > { %v367_v38 = vsel %vm347_vm2, %v802_v0, %v365_v13  ;;  %735 = vmatpush.msra.mxu2 %v447_v35  ;;  %508 = vmatpush.msra.mxu0 %v447_v35 }
  0xd4   : > { %v454_v40 = vsel %vm452_vm5, %v451_v39, %v367_v38  ;;  %720 = vmatmul.msk.f32.vlgmr.msra.gmra.mxu2 %vm470_vm9, %v467_v36  ;;  %717 = vmatmul.msk.f32.vlgmr.msra.gmra.mxu0 %vm470_vm9, %v464_v10 }
  0xd5   : > { %v457_v41 = vsel %vm455_vm6, %v454_v40, %v387_v23 }
  0xd6   : > { %542 = vmatpush.msra.mxu1 %v457_v41  ;;  %738 = vmatpush.msra.mxu3 %v457_v41 }
  0xd8   : > { %739 = vmatpush.msra.mxu3 %v448_v42  ;;  %543 = vmatpush.msra.mxu1 %v448_v42 }
  0xd9   : > { %727 = vmatmul.msk.f32.vlgmr.msra.gmra.mxu3 %vm470_vm9, %v467_v36  ;;  %724 = vmatmul.msk.f32.vlgmr.msra.gmra.mxu1 %vm470_vm9, %v464_v10 }
  0xdc   : > { %721 = vmatmul.msk.f32.gmra.mxu2 %vm470_vm9, %v468_v5  ;;  %718 = vmatmul.msk.f32.gmra.mxu0 %vm470_vm9, %v465_v43 }
  0xe1   : > { %728 = vmatmul.msk.f32.gmra.mxu3 %vm470_vm9, %v468_v5  ;;  %725 = vmatmul.msk.f32.gmra.mxu1 %vm470_vm9, %v465_v43 }
  0xe4   : > { %722 = vmatmul.msk.f32.gmra.mxu2 %vm470_vm9, %v469_v44  ;;  %719 = vmatmul.msk.f32.gmra.mxu0 %vm470_vm9, %v466_v45 }
  0xe9   : > { %729 = vmatmul.msk.f32.gmra.mxu3 %vm470_vm9, %v469_v44  ;;  %726 = vmatmul.msk.f32.gmra.mxu1 %vm470_vm9, %v466_v45 }
 0x151   : > { %v510_v46 = vpop.f32.mrf.mxu0 }
 0x152   : > { %563 = vst [vmem:[%s301_s24] sm:$0xff] %v510_v46 }
 0x156   : > { %v545_v47 = vpop.f32.mrf.mxu1 }
 0x157   : > { %v519_v48 = vpop.f32.mrf.mxu2  ;;  %564 = vst [vmem:[%s301_s24 + $0x8] sm:$0xff] %v545_v47 }
 0x158   : > { %569 = vst [vmem:[%s301_s24 + $0x30] sm:$0xff] %v519_v48 }
 0x159   : > { %v513_v49 = vpop.f32.mrf.mxu0 }
 0x15a   : > { %565 = vst [vmem:[%s301_s24 + $0x10] sm:$0xff] %v513_v49 }
 0x15c   : > { %v554_v50 = vpop.f32.mrf.mxu3 }
 0x15d   : > { %570 = vst [vmem:[%s301_s24 + $0x38] sm:$0xff] %v554_v50 }
 0x15e   : > { %v548_v51 = vpop.f32.mrf.mxu1 }
 0x15f   : > { %v522_v52 = vpop.f32.mrf.mxu2  ;;  %566 = vst [vmem:[%s301_s24 + $0x18] sm:$0xff] %v548_v51 }
 0x160   : > { %571 = vst [vmem:[%s301_s24 + $0x40] sm:$0xff] %v522_v52 }
 0x161   : > { %v516_v53 = vpop.f32.mrf.mxu0 }
 0x162   : > { %567 = vst [vmem:[%s301_s24 + $0x20] sm:$0xff] %v516_v53 }
 0x164   : > { %v557_v54 = vpop.f32.mrf.mxu3 }
 0x165   : > { %572 = vst [vmem:[%s301_s24 + $0x48] sm:$0xff] %v557_v54 }
 0x166   : > { %v551_v55 = vpop.f32.mrf.mxu1 }
 0x167   : > { %v525_v56 = vpop.f32.mrf.mxu2  ;;  %568 = vst [vmem:[%s301_s24 + $0x28] sm:$0xff] %v551_v55 }
 0x168   : > { %573 = vst [vmem:[%s301_s24 + $0x50] sm:$0xff] %v525_v56 }
 0x16c   : > { %v560_v57 = vpop.f32.mrf.mxu3 }
 0x16d   : > { %574 = vst [vmem:[%s301_s24 + $0x58] sm:$0xff] %v560_v57 }
 0x16e PF: > { %s14_s17 = sadd.s32 1, %s825_s17   ;;  %s989_s15 = smov %s821_s16 }
 0x16f   : > { %p11_p5 = scmp.ge.s32.totalorder %s14_s17, 4   ;;  %s990_s16 = smov %s992_s18 }
 0x171   :  { %13 = sbr.rel (!%p11_p5) target bundleno = 2 (0x2), region = 79 }

</bundles_post_ra>
